<compile_context>
chip_gen: v7x
topology: tpu7x:2x2x1
jax: 0.10.0
libtpu: 0.0.40
codegen_flags: <defaults>
</compile_context>

<pallas_src>
import jax
import jax.numpy as jnp
from jax import lax
from jax.experimental import pallas as pl
from jax.experimental.pallas import tpu as pltpu


def _round_up(n, m):
    return ((n + m - 1) // m) * m


def _vmem_capacity_bytes():
    try:
        info = pltpu.get_tpu_info()
        cap = int(getattr(info, "vmem_capacity_bytes"))
        if cap > 0:
            return cap
    except Exception:
        pass
    return 64 * 1024 * 1024  # conservative: v7x per-TensorCore VMEM


def _vmem_limit_bytes(cap):
    return int(max(16 * 2**20, min(int(0.85 * cap), 112 * 2**20)))


def _is_v7x():
    try:
        return "v7" in jax.devices()[0].device_kind.lower()
    except Exception:
        return False


def _choose_tiles(B, C, L, itemsize, slab_budget, want_two_batch_blocks):
    """Pick (TB, TL): the largest batch block whose double-buffered, layout-padded
    (TB, C, TL) input slab fits the VMEM budget; chunk L only when needed."""
    sublane = 8 * max(1, 4 // max(itemsize, 1))       # f32->8, bf16->16, int8->32
    c_pad = _round_up(C, sublane)
    l_pad = _round_up(L, 128)

    def slab(tb, tl_pad):                              # double-buffered x block
        return 2 * tb * c_pad * tl_pad * itemsize

    tb_pref = min(128, _round_up(B, 8))

    # 1) Prefer a single L chunk; shrink the batch block (down to 8 rows) if needed.
    tb = tb_pref
    while slab(tb, l_pad) > slab_budget and tb > 8:
        tb = max(8, _round_up(tb // 2, 8))
    tl = L
    # 2) If even an 8-row slab overflows, keep a large batch block and chunk L.
    if slab(tb, l_pad) > slab_budget:
        tb = tb_pref
        tl = (slab_budget // (2 * tb * c_pad * itemsize)) // 128 * 128
        while tl < 128 and tb > 8:
            tb = max(8, _round_up(tb // 2, 8))
            tl = (slab_budget // (2 * tb * c_pad * itemsize)) // 128 * 128
        tl = min(max(tl, 128), l_pad)
        if tl >= L:
            tl = L
    # 3) v7x megacore only: give both TensorCores at least one batch block.
    if want_two_batch_blocks and B >= 16 and pl.cdiv(B, tb) < 2:
        tb = max(8, _round_up(pl.cdiv(B, 2), 8))
    return int(tb), int(tl)


def _make_kernel(tb, tl, L):
    inv_L = 1.0 / float(L)
    needs_mask = (L % tl) != 0   # partial trailing L chunk reads unspecified lanes

    def kernel(x_ref, w1t_ref, w2t_ref, o_ref, sum_ref, max_ref):
        k = pl.program_id(1)
        nl = pl.num_programs(1)

        @pl.when(k == 0)
        def _():
            sum_ref[...] = jnp.zeros_like(sum_ref)
            max_ref[...] = jnp.full_like(max_ref, -jnp.inf)

        x = x_ref[...]                                   # (tb, C, tl), native dtype
        if needs_mask:
            lane = lax.broadcasted_iota(jnp.int32, x.shape, 2)
            valid = (k * tl + lane) < L
            x_max = jnp.where(valid, x, jnp.array(-jnp.inf, dtype=x.dtype))
            x_sum = jnp.where(valid, x, jnp.array(0, dtype=x.dtype))
        else:
            x_max = x_sum = x

        # Running reductions over the length axis (no full-slab f32 upcast).
        sum_ref[...] += jnp.sum(x_sum, axis=-1, dtype=jnp.float32)
        max_ref[...] = jnp.maximum(max_ref[...],
                                   jnp.max(x_max, axis=-1).astype(jnp.float32))

        @pl.when(k == nl - 1)
        def _():
            avg = sum_ref[...] * inv_L                   # (tb, C) f32
            mx = max_ref[...]                            # (tb, C) f32
            w1t = w1t_ref[...].astype(jnp.float32)       # (C, Cr)
            w2t = w2t_ref[...].astype(jnp.float32)       # (Cr, C)

            # Both pooled branches share fc1/fc2 -> one stacked pass through the MXU.
            pooled = jnp.concatenate([avg, mx], axis=0)  # (2*tb, C)
            h = jnp.maximum(
                jnp.dot(pooled, w1t, preferred_element_type=jnp.float32), 0.0)
            y = jnp.dot(h, w2t, preferred_element_type=jnp.float32)
            out = y[:tb] + y[tb:]                        # (tb, C)

            # Numerically stable softmax over channels (lane axis), exact division.
            m = jnp.max(out, axis=-1, keepdims=True)
            e = jnp.exp(out - m)
            s = jnp.sum(e, axis=-1, keepdims=True)
            o_ref[...] = (e / s).astype(o_ref.dtype)

    return kernel


def channel_attention_1d(x, w1, w2, *, tb=None, tl=None):
    """x: (B, C, L); w1: (C//r, C); w2: (C, C//r). Returns softmax weights (B, C, 1)."""
    B, C, L = x.shape
    Cr = w1.shape[0]
    assert w1.shape == (Cr, C) and w2.shape == (C, Cr)

    itemsize = jnp.dtype(x.dtype).itemsize
    vmem_cap = _vmem_capacity_bytes()
    auto_tb, auto_tl = _choose_tiles(B, C, L, itemsize, int(0.40 * vmem_cap), _is_v7x())
    tb = auto_tb if tb is None else int(tb)
    tl = auto_tl if tl is None else int(tl)
    assert tb % 8 == 0 or tb == B
    assert tl == L or tl % 128 == 0

    nb = pl.cdiv(B, tb)
    nl = pl.cdiv(L, tl)

    # Transpose the 1x1-conv weights once so the FC layers are row-major matmuls.
    w1t = w1.T                                           # (C, Cr)
    w2t = w2.T                                           # (Cr, C)

    flops = 2 * B * C * L + 8 * B * C * Cr
    bytes_accessed = (B * C * L + B * C + 2 * C * Cr) * itemsize

    out = pl.pallas_call(
        _make_kernel(tb, tl, L),
        out_shape=jax.ShapeDtypeStruct((B, C), x.dtype),
        grid_spec=pltpu.PrefetchScalarGridSpec(
            num_scalar_prefetch=0,
            grid=(nb, nl),
            in_specs=[
                pl.BlockSpec((tb, C, tl), lambda b, k: (b, 0, k)),
                pl.BlockSpec((C, Cr), lambda b, k: (0, 0)),   # resident weights
                pl.BlockSpec((Cr, C), lambda b, k: (0, 0)),
            ],
            out_specs=pl.BlockSpec((tb, C), lambda b, k: (b, 0)),
            scratch_shapes=[
                pltpu.VMEM((tb, C), jnp.float32),   # running sum
                pltpu.VMEM((tb, C), jnp.float32),   # running max
            ],
        ),
        compiler_params=pltpu.CompilerParams(
            dimension_semantics=("parallel", "arbitrary"),
            vmem_limit_bytes=_vmem_limit_bytes(vmem_cap),
        ),
        cost_estimate=pl.CostEstimate(
            flops=flops, transcendentals=B * C, bytes_accessed=bytes_accessed),
    )(x, w1t, w2t)

    return out.reshape(B, C, 1)


def _reference(x, w1, w2):
    avg = jnp.mean(x, axis=-1, keepdims=True)            # (B, C, 1)
    mx = jnp.max(x, axis=-1, keepdims=True)              # (B, C, 1)

    def branch(v):
        h = jnp.einsum("rc,bcl->brl", w1, v)
        h = jnp.maximum(h, 0.0)
        return jnp.einsum("cr,brl->bcl", w2, h)

    out = branch(avg) + branch(mx)
    return jax.nn.softmax(out, axis=1)


if __name__ == "__main__":
    key = jax.random.PRNGKey(0)
    B, C, L, ratio = 2, 16, 16, 4
    Cr = C // ratio

    kx, k1, k2 = jax.random.split(key, 3)
    x = jax.random.normal(kx, (B, C, L), dtype=jnp.float32)
    # Deterministic "Kaiming-ish" init for the 1x1 conv weights (no bias).
    w1 = jax.random.normal(k1, (Cr, C), dtype=jnp.float32) * (2.0 / C) ** 0.5
    w2 = jax.random.normal(k2, (C, Cr), dtype=jnp.float32) * (2.0 / Cr) ** 0.5

    out = jax.block_until_ready(channel_attention_1d(x, w1, w2))
    ref = _reference(x, w1, w2)
    assert out.shape == (B, C, 1)
    # Softmax uses exact division now; remaining tolerance only covers MXU
    # multi-pass vs. XLA reassociation in the tiny FC matmuls.
    assert jnp.allclose(out, ref, atol=2e-4, rtol=2e-4), float(jnp.max(jnp.abs(out - ref)))

    # Second check: exercise the partial trailing batch block (B % TB != 0) and the
    # L-chunked running-reduction path (L % TL != 0) with forced small tiles.
    B2, L2 = 10, 300
    x2 = jax.random.normal(jax.random.fold_in(kx, 1), (B2, C, L2), dtype=jnp.float32)
    out2 = jax.block_until_ready(channel_attention_1d(x2, w1, w2, tb=8, tl=128))
    ref2 = _reference(x2, w1, w2)
    assert out2.shape == (B2, C, 1)
    assert jnp.allclose(out2, ref2, atol=2e-4, rtol=2e-4), float(jnp.max(jnp.abs(out2 - ref2)))

    print("KERNEL_OK")
</pallas_src>

<mosaic_0001>
module attributes {stable_mosaic.version = 11 : i64} {
  func.func @kernel(%arg0: i32, %arg1: i32, %arg2: memref<8x16x16xf32, #tpu.memory_space<vmem>>, %arg3: memref<16x4xf32, #tpu.memory_space<vmem>>, %arg4: memref<4x16xf32, #tpu.memory_space<vmem>>, %arg5: memref<8x16xf32, #tpu.memory_space<vmem>>, %arg6: memref<8x16xf32, #tpu.memory_space<vmem>>, %arg7: memref<8x16xf32, #tpu.memory_space<vmem>>) attributes {dimension_semantics = [#tpu.dimension_semantics<parallel>, #tpu.dimension_semantics<arbitrary>], iteration_bounds = array<i64: 1, 1>, scalar_prefetch = 0 : i64, scratch_operands = 2 : i64, tpu.core_type = #tpu.core_type<tc>, window_params = [{transform_indices = @transform_0, window_bounds = array<i64: 8, 16, 16>}, {pipeline_mode = #tpu.pipeline_mode<synchronous>, transform_indices = @transform_1, window_bounds = array<i64: 16, 4>}, {pipeline_mode = #tpu.pipeline_mode<synchronous>, transform_indices = @transform_2, window_bounds = array<i64: 4, 16>}, {transform_indices = @transform_3, window_bounds = array<i64: 8, 16>}]} {
    %c0_i32 = arith.constant 0 : i32
    %0 = arith.cmpi eq, %arg1, %c0_i32 : i32
    %1 = arith.extui %0 : i1 to i32
    %c0_i32_0 = arith.constant 0 : i32
    %2 = arith.cmpi ne, %1, %c0_i32_0 : i32
    scf.if %2 {
      %cst_14 = arith.constant 0.000000e+00 : f32
      %15 = vector.broadcast %cst_14 : f32 to vector<8x16xf32>
      %c0_15 = arith.constant 0 : index
      %c0_16 = arith.constant 0 : index
      %16 = vector.load %arg6[%c0_15, %c0_16] : memref<8x16xf32, #tpu.memory_space<vmem>>, vector<8x16xf32>
      tpu.vector_store %arg6[%c0_15, %c0_16], %15 {strides = array<i32>} : memref<8x16xf32, #tpu.memory_space<vmem>>, vector<8x16xf32>,
      %cst_17 = arith.constant 0xFF800000 : f32
      %17 = vector.broadcast %cst_17 : f32 to vector<8x16xf32>
      %c0_18 = arith.constant 0 : index
      %c0_19 = arith.constant 0 : index
      %18 = vector.load %arg7[%c0_18, %c0_19] : memref<8x16xf32, #tpu.memory_space<vmem>>, vector<8x16xf32>
      tpu.vector_store %arg7[%c0_18, %c0_19], %17 {strides = array<i32>} : memref<8x16xf32, #tpu.memory_space<vmem>>, vector<8x16xf32>,
    } else {
    }
    %c0 = arith.constant 0 : index
    %c0_1 = arith.constant 0 : index
    %c0_2 = arith.constant 0 : index
    %3 = vector.load %arg2[%c0, %c0_1, %c0_2] : memref<8x16x16xf32, #tpu.memory_space<vmem>>, vector<8x16x16xf32>
    %c0_3 = arith.constant 0 : index
    %c0_4 = arith.constant 0 : index
    %4 = vector.load %arg6[%c0_3, %c0_4] : memref<8x16xf32, #tpu.memory_space<vmem>>, vector<8x16xf32>
    %cst = arith.constant dense<0.000000e+00> : vector<8x16xf32>
    %5 = vector.multi_reduction <add>, %3, %cst [2] : vector<8x16x16xf32> to vector<8x16xf32>
    %6 = arith.addf %4, %5 : vector<8x16xf32>
    %c0_5 = arith.constant 0 : index
    %c0_6 = arith.constant 0 : index
    %7 = vector.load %arg6[%c0_5, %c0_6] : memref<8x16xf32, #tpu.memory_space<vmem>>, vector<8x16xf32>
    tpu.vector_store %arg6[%c0_5, %c0_6], %6 {strides = array<i32>} : memref<8x16xf32, #tpu.memory_space<vmem>>, vector<8x16xf32>,
    %c0_7 = arith.constant 0 : index
    %c0_8 = arith.constant 0 : index
    %8 = vector.load %arg7[%c0_7, %c0_8] : memref<8x16xf32, #tpu.memory_space<vmem>>, vector<8x16xf32>
    %cst_9 = arith.constant dense<0xFF800000> : vector<8x16xf32>
    %9 = vector.multi_reduction <maximumf>, %3, %cst_9 [2] : vector<8x16x16xf32> to vector<8x16xf32>
    %10 = arith.maximumf %8, %9 : vector<8x16xf32>
    %c0_10 = arith.constant 0 : index
    %c0_11 = arith.constant 0 : index
    %11 = vector.load %arg7[%c0_10, %c0_11] : memref<8x16xf32, #tpu.memory_space<vmem>>, vector<8x16xf32>
    tpu.vector_store %arg7[%c0_10, %c0_11], %10 {strides = array<i32>} : memref<8x16xf32, #tpu.memory_space<vmem>>, vector<8x16xf32>,
    %c0_i32_12 = arith.constant 0 : i32
    %12 = arith.cmpi eq, %arg1, %c0_i32_12 : i32
    %13 = arith.extui %12 : i1 to i32
    %c0_i32_13 = arith.constant 0 : i32
    %14 = arith.cmpi ne, %13, %c0_i32_13 : i32
    scf.if %14 {
      %c0_14 = arith.constant 0 : index
      %c0_15 = arith.constant 0 : index
      %15 = vector.load %arg6[%c0_14, %c0_15] : memref<8x16xf32, #tpu.memory_space<vmem>>, vector<8x16xf32>
      %cst_16 = arith.constant 6.250000e-02 : f32
      %16 = vector.broadcast %cst_16 : f32 to vector<8x16xf32>
      %17 = arith.mulf %15, %16 : vector<8x16xf32>
      %c0_17 = arith.constant 0 : index
      %c0_18 = arith.constant 0 : index
      %18 = vector.load %arg7[%c0_17, %c0_18] : memref<8x16xf32, #tpu.memory_space<vmem>>, vector<8x16xf32>
      %c0_19 = arith.constant 0 : index
      %c0_20 = arith.constant 0 : index
      %19 = vector.load %arg3[%c0_19, %c0_20] : memref<16x4xf32, #tpu.memory_space<vmem>>, vector<16x4xf32>
      %c0_21 = arith.constant 0 : index
      %c0_22 = arith.constant 0 : index
      %20 = vector.load %arg4[%c0_21, %c0_22] : memref<4x16xf32, #tpu.memory_space<vmem>>, vector<4x16xf32>
      %21 = tpu.concatenate %17, %18 in 0 : vector<8x16xf32>, vector<8x16xf32> -> vector<16x16xf32>
      %cst_23 = arith.constant dense<0.000000e+00> : vector<16x4xf32>
      %22 = tpu.matmul %21, %19, %cst_23 {dimension_numbers = #tpu.dot_dimension_numbers<[1], [0], [0], [1], [0, 0, 1, 1], [], []>} : vector<16x16xf32>, vector<16x4xf32>, vector<16x4xf32> -> vector<16x4xf32>
      %cst_24 = arith.constant 0.000000e+00 : f32
      %23 = vector.broadcast %cst_24 : f32 to vector<16x4xf32>
      %24 = arith.maximumf %22, %23 : vector<16x4xf32>
      %cst_25 = arith.constant dense<0.000000e+00> : vector<16x16xf32>
      %25 = tpu.matmul %24, %20, %cst_25 {dimension_numbers = #tpu.dot_dimension_numbers<[1], [0], [0], [1], [0, 0, 1, 1], [], []>} : vector<16x4xf32>, vector<4x16xf32>, vector<16x16xf32> -> vector<16x16xf32>
      %26 = vector.extract_strided_slice %25 {offsets = [0, 0], sizes = [8, 16], strides = [1, 1]} : vector<16x16xf32> to vector<8x16xf32>
      %27 = vector.extract_strided_slice %25 {offsets = [8, 0], sizes = [8, 16], strides = [1, 1]} : vector<16x16xf32> to vector<8x16xf32>
      %28 = arith.addf %26, %27 : vector<8x16xf32>
      %cst_26 = arith.constant dense<0xFF800000> : vector<8xf32>
      %29 = vector.multi_reduction <maximumf>, %28, %cst_26 [1] : vector<8x16xf32> to vector<8xf32>
      %30 = vector.shape_cast %29 : vector<8xf32> to vector<8x1xf32>
      %31 = vector.broadcast %30 : vector<8x1xf32> to vector<8x16xf32>
      %32 = arith.subf %28, %31 : vector<8x16xf32>
      %33 = math.exp %32 : vector<8x16xf32>
      %cst_27 = arith.constant dense<0.000000e+00> : vector<8xf32>
      %34 = vector.multi_reduction <add>, %33, %cst_27 [1] : vector<8x16xf32> to vector<8xf32>
      %35 = vector.shape_cast %34 : vector<8xf32> to vector<8x1xf32>
      %36 = vector.broadcast %35 : vector<8x1xf32> to vector<8x16xf32>
      %37 = arith.divf %33, %36 : vector<8x16xf32>
      %c0_28 = arith.constant 0 : index
      %c0_29 = arith.constant 0 : index
      %38 = vector.load %arg5[%c0_28, %c0_29] : memref<8x16xf32, #tpu.memory_space<vmem>>, vector<8x16xf32>
      tpu.vector_store %arg5[%c0_28, %c0_29], %37 {strides = array<i32>} : memref<8x16xf32, #tpu.memory_space<vmem>>, vector<8x16xf32>,
    } else {
    }
    return
  }
  func.func @transform_0(%arg0: i32, %arg1: i32) -> (i32, i32, i32) {
    %c0_i32 = arith.constant 0 : i32
    %c0_i32_0 = arith.constant 0 : i32
    return %arg0, %c0_i32, %arg1 : i32, i32, i32
  }
  func.func @transform_1(%arg0: i32, %arg1: i32) -> (i32, i32) {
    %c0_i32 = arith.constant 0 : i32
    %c0_i32_0 = arith.constant 0 : i32
    %c0_i32_1 = arith.constant 0 : i32
    return %c0_i32, %c0_i32_0 : i32, i32
  }
  func.func @transform_2(%arg0: i32, %arg1: i32) -> (i32, i32) {
    %c0_i32 = arith.constant 0 : i32
    %c0_i32_0 = arith.constant 0 : i32
    %c0_i32_1 = arith.constant 0 : i32
    return %c0_i32, %c0_i32_0 : i32, i32
  }
  func.func @transform_3(%arg0: i32, %arg1: i32) -> (i32, i32) {
    %c0_i32 = arith.constant 0 : i32
    %c0_i32_0 = arith.constant 0 : i32
    return %arg0, %c0_i32 : i32, i32
  }
}

</mosaic_0001>

<bundles_post_ra>
// kernel: tpu_custom_call.1
= control target key start
LH: loop header
LB: loop body
LE: loop exit
PB: predicated region body
PF: predicated region fallthrough
CT: control target
= control target key end

     0   :  { %8 = vsyncpa [#allocation5], 0  ;;  %s840_s0 = inlined_call_operand.hbm [shape: f32[2,16,16], index: 0, kind: input, shape index: {}]   ;;  %s841_s1 = inlined_call_operand.vmem [shape: f32[16,4], index: 1, kind: input, shape index: {}]   ;;  %s842_s2 = inlined_call_operand.vmem [shape: f32[4,16], index: 2, kind: input, shape index: {}]   ;;  %s843_s3 = inlined_call_operand.hbm [shape: f32[2,16], index: 3, kind: output, shape index: {}]  }
   0x1   :  { %9 = vsyncpa [#allocation6], 0 }
   0x2   :  { %14 = vsyncadd [#allocation5], 1536  ;;  %s654_s12 = smov [#allocation4]   ;;  %s606_s16 = scalar_lea.hbm %s840_s0, 512 }
   0x3   :  { %s15_s13 = sshll.u32 %s654_s12, 4  ;;  %p607_p0 = scmp.ne.s32.totalorder %s840_s0, %s606_s16  ;;  %s16_s13 = int_to_ptr.vmem [resolvable:$true] %s15_s13 }
   0x4   :  { %p610_p1 = scmp.lt.u32.totalorder %s606_s16, %s840_s0 }
   0x6   :  { %p612_p2 = pnand %p610_p1, %p607_p0 }
   0x8   :  { %615 = shalt.err (!%p612_p2)
}
   0x9   :  { %s616_s21 = scalar_lea.vmem %s16_s13, 512  ;;  %s620_s22 = scalar_lea.vmem %s16_s13, 2048 }
   0xa   :  { %p617_p3 = scmp.ne.s32.totalorder %s16_s13, %s616_s21  ;;  %p621_p4 = scmp.lt.s32.totalorder %s16_s13, %s16_s13 }
   0xb   :  { %p622_p5 = scmp.lt.s32.totalorder %s620_s22, %s616_s21 }
   0xd   :  { %p623_p6 = por %p622_p5, %p621_p4 }
   0xf   :  { %p624_p7 = pnand %p623_p6, %p617_p3 }
  0x11   :  { %627 = shalt.err (!%p624_p7)
}
  0x12   :  { %s655_s23 = smov 128   ;;  %s656_s24 = smov 8  }
  0x13   :  { %21 = dma.hbm_to_vmem [thread:$0]  %s840_s0, 512, %s16_s13, [#allocation5], %s655_s23, %s655_s23, %s656_s24  }
  0x14   :  { %650 = dma.done.wait [#allocation5], 2048  }
  0x15   :  { %651 = vsyncadd [#allocation5], 4294965248  ;;  %vm33_vm0 = vcmask 130048   ;;  %v38_v0 = vld [vmem:[#allocation4 + $0x10] sm:$0xff]  ;;  %v36_v1 = vld [vmem:[#allocation4] sm:$0xff]  ;;  %v657_v46 = vmov 0.0  }
  0x16   :  { %v39_v2 = vld [vmem:[#allocation4 + $0x18] sm:$0xff]  ;;  %v60_v3 = vsel %vm33_vm0, %v38_v0, 0.0  ;;  %v54_v4 = vsel %vm33_vm0, %v36_v1, 0.0  ;;  %v37_v5 = vld [vmem:[#allocation4 + $0x8] sm:$0xff]  ;;  %v40_v9 = vld [vmem:[#allocation4 + $0x20] sm:$0xff]  ;;  %v212_v21 = vsel %vm33_vm0, %v36_v1, -inf  ;;  %v118_v1 = vlaneseq }
  0x17   :  { %61 = vadd.xlane.f32.xlu1 %v60_v3  ;;  %55 = vadd.xlane.f32.xlu0 %v54_v4  ;;  %v63_v6 = vsel %vm33_vm0, %v39_v2, 0.0  ;;  %v57_v7 = vsel %vm33_vm0, %v37_v5, 0.0  ;;  %v41_v8 = vld [vmem:[#allocation4 + $0x28] sm:$0xff]  ;;  %v66_v11 = vsel %vm33_vm0, %v40_v9, 0.0  ;;  %v43_v12 = vld [vmem:[#allocation4 + $0x38] sm:$0xff]  ;;  %v42_v13 = vld [vmem:[#allocation4 + $0x30] sm:$0xff] }
  0x18   :  { %v69_v10 = vsel %vm33_vm0, %v41_v8, 0.0  ;;  %v75_v14 = vsel %vm33_vm0, %v43_v12, 0.0  ;;  %v72_v15 = vsel %vm33_vm0, %v42_v13, 0.0  ;;  %v45_v16 = vld [vmem:[#allocation4 + $0x48] sm:$0xff]  ;;  %v44_v17 = vld [vmem:[#allocation4 + $0x40] sm:$0xff]  ;;  %v215_v20 = vsel %vm33_vm0, %v37_v5, -inf }
  0x19   :  { %v81_v18 = vsel %vm33_vm0, %v45_v16, 0.0  ;;  %v78_v19 = vsel %vm33_vm0, %v44_v17, 0.0  ;;  %v221_v22 = vsel %vm33_vm0, %v39_v2, -inf  ;;  %v218_v23 = vsel %vm33_vm0, %v38_v0, -inf  ;;  %v47_v24 = vld [vmem:[#allocation4 + $0x58] sm:$0xff]  ;;  %v46_v25 = vld [vmem:[#allocation4 + $0x50] sm:$0xff] }
  0x1a   :  { %v87_v26 = vsel %vm33_vm0, %v47_v24, 0.0  ;;  %v84_v27 = vsel %vm33_vm0, %v46_v25, 0.0  ;;  %v227_v28 = vsel %vm33_vm0, %v41_v8, -inf  ;;  %v224_v29 = vsel %vm33_vm0, %v40_v9, -inf  ;;  %v49_v30 = vld [vmem:[#allocation4 + $0x68] sm:$0xff]  ;;  %v48_v31 = vld [vmem:[#allocation4 + $0x60] sm:$0xff] }
  0x1b   :  { %64 = vadd.xlane.f32.xlu1 %v63_v6  ;;  %58 = vadd.xlane.f32.xlu0 %v57_v7  ;;  %v93_v32 = vsel %vm33_vm0, %v49_v30, 0.0  ;;  %v90_v33 = vsel %vm33_vm0, %v48_v31, 0.0  ;;  %v233_v34 = vsel %vm33_vm0, %v43_v12, -inf  ;;  %v230_v35 = vsel %vm33_vm0, %v42_v13, -inf  ;;  %v51_v36 = vld [vmem:[#allocation4 + $0x78] sm:$0xff]  ;;  %v50_v37 = vld [vmem:[#allocation4 + $0x70] sm:$0xff] }
  0x1c   :  { %v99_v38 = vsel %vm33_vm0, %v51_v36, 0.0  ;;  %v96_v39 = vsel %vm33_vm0, %v50_v37, 0.0  ;;  %v239_v40 = vsel %vm33_vm0, %v45_v16, -inf  ;;  %v236_v41 = vsel %vm33_vm0, %v44_v17, -inf  ;;  %34 = vst.msk [vmem:[#allocation2] sm:$0xff] %vm33_vm0, %v657_v46  ;;  %v364_v50 = vld [vmem:[%s841_s1] sm:$0xff] }
  0x1d   :  { %v245_v42 = vsel %vm33_vm0, %v47_v24, -inf  ;;  %v242_v43 = vsel %vm33_vm0, %v46_v25, -inf  ;;  %v251_v44 = vsel %vm33_vm0, %v49_v30, -inf  ;;  %v248_v45 = vsel %vm33_vm0, %v48_v31, -inf  ;;  %v365_v51 = vld [vmem:[%s841_s1 + $0x8] sm:$0xff] }
  0x1e   :  { %v257_v47 = vsel %vm33_vm0, %v51_v36, -inf  ;;  %v254_v48 = vsel %vm33_vm0, %v50_v37, -inf  ;;  %v658_v49 = vmov -inf   ;;  %v590_v52 = vpack.c.bf16 %v365_v51, %v364_v50 }
  0x1f   :  { %70 = vadd.xlane.f32.xlu1 %v69_v10  ;;  %67 = vadd.xlane.f32.xlu0 %v66_v11  ;;  %35 = vst.msk [vmem:[#allocation3] sm:$0xff] %vm33_vm0, %v658_v49  ;;  %v119_v4 = vand.u32 127, %v118_v1  ;;  %v121_v8 = vshrl.u32 %v118_v1, 7  ;;  %vm129_vm1 = vcmask 130112   ;;  %vm194_vm2 = vcmask 1041409  }
  0x20   :  { %591 = vmatprep.subr.bf16.mxu0 %v590_v52  ;;  %vm196_vm3 = vcmask 1042434   ;;  %vm198_vm4 = vcmask 1043459   ;;  %vm200_vm5 = vcmask 1044484   ;;  %vm202_vm6 = vcmask 1045509  }
  0x21   :  { %593 = vmatpush3.bf16.msra.mxu0 %v590_v52  ;;  %v124_v5 = vadd.s32 4294967288, %v119_v4  ;;  %v748_v12 = vsub.s32 %v119_v4, %v121_v8  ;;  %vm204_vm7 = vcmask 1046534   ;;  %vm206_vm8 = vcmask 1047559  }
  0x22   :  { %vm457_vm9 = vcmask 1043456   ;;  %vm450_vm10 = vcmask 31744  }
  0x23   :  { %76 = vadd.xlane.f32.xlu1 %v75_v14  ;;  %73 = vadd.xlane.f32.xlu0 %v72_v15  ;;  %v742_v9 = vsub.s32 %v124_v5, %v121_v8 }
  0x27   :  { %82 = vadd.xlane.f32.xlu1 %v81_v18  ;;  %79 = vadd.xlane.f32.xlu0 %v78_v19 }
  0x2b   :  { %216 = vmax.xlane.f32.xlu1 %v215_v20  ;;  %213 = vmax.xlane.f32.xlu0 %v212_v21 }
  0x2f   :  { %222 = vmax.xlane.f32.xlu1 %v221_v22  ;;  %219 = vmax.xlane.f32.xlu0 %v218_v23 }
  0x33   :  { %88 = vadd.xlane.f32.xlu1 %v87_v26  ;;  %85 = vadd.xlane.f32.xlu0 %v84_v27 }
  0x37   :  { %228 = vmax.xlane.f32.xlu1 %v227_v28  ;;  %225 = vmax.xlane.f32.xlu0 %v224_v29 }
  0x3b   :  { %94 = vadd.xlane.f32.xlu1 %v93_v32  ;;  %91 = vadd.xlane.f32.xlu0 %v90_v33 }
  0x3f   :  { %234 = vmax.xlane.f32.xlu1 %v233_v34  ;;  %231 = vmax.xlane.f32.xlu0 %v230_v35 }
  0x43   :  { %100 = vadd.xlane.f32.xlu1 %v99_v38  ;;  %97 = vadd.xlane.f32.xlu0 %v96_v39 }
  0x47   :  { %240 = vmax.xlane.f32.xlu1 %v239_v40  ;;  %237 = vmax.xlane.f32.xlu0 %v236_v41 }
  0x4b   :  { %246 = vmax.xlane.f32.xlu1 %v245_v42  ;;  %243 = vmax.xlane.f32.xlu0 %v242_v43 }
  0x4f   :  { %252 = vmax.xlane.f32.xlu1 %v251_v44  ;;  %249 = vmax.xlane.f32.xlu0 %v248_v45 }
  0x53   :  { %258 = vmax.xlane.f32.xlu1 %v257_v47  ;;  %255 = vmax.xlane.f32.xlu0 %v254_v48  ;;  %v52_v47 = vld [vmem:[#allocation2] sm:$0xff] }
  0xa4   :  { %v62_v53 = vpop.xlane.xlu1 %61  ;;  %v56_v54 = vpop.xlane.xlu0 %55 }
  0xa5   :  { %v134_v19 = vrot.slane %v62_v53, %v748_v12  ;;  %v123_v20 = vrot.slane %v56_v54, %v748_v12 }
  0xa8   :  { %v65_v55 = vpop.xlane.xlu1 %64  ;;  %v59_v56 = vpop.xlane.xlu0 %58 }
  0xa9   :  { %v138_v13 = vrot.slane %v65_v55, %v742_v9  ;;  %v128_v14 = vrot.slane %v59_v56, %v742_v9 }
  0xab   :  { %v139_v25 = vsel %vm129_vm1, %v138_v13, %v134_v19  ;;  %v130_v26 = vsel %vm129_vm1, %v128_v14, %v123_v20 }
  0xac   :  { %v71_v57 = vpop.xlane.xlu1 %70  ;;  %v68_v58 = vpop.xlane.xlu0 %67  ;;  %v195_v35 = vsel %vm194_vm2, %v139_v25, %v130_v26 }
  0xad   :  { %v147_v15 = vrot.slane %v71_v57, %v742_v9  ;;  %v143_v16 = vrot.slane %v68_v58, %v748_v12 }
  0xaf   :  { %v148_v29 = vsel %vm129_vm1, %v147_v15, %v143_v16 }
  0xb0   :  { %v77_v59 = vpop.xlane.xlu1 %76  ;;  %v74_v60 = vpop.xlane.xlu0 %73  ;;  %v197_v37 = vsel %vm196_vm3, %v148_v29, %v195_v35 }
  0xb1   :  { %v156_v21 = vrot.slane %v77_v59, %v742_v9  ;;  %v152_v22 = vrot.slane %v74_v60, %v748_v12 }
  0xb3   :  { %v157_v34 = vsel %vm129_vm1, %v156_v21, %v152_v22 }
  0xb4   :  { %v83_v61 = vpop.xlane.xlu1 %82  ;;  %v80_v62 = vpop.xlane.xlu0 %79  ;;  %v199_v39 = vsel %vm198_vm4, %v157_v34, %v197_v37 }
  0xb5   :  { %v165_v23 = vrot.slane %v83_v61, %v742_v9  ;;  %v161_v24 = vrot.slane %v80_v62, %v748_v12 }
  0xb7   :  { %v166_v36 = vsel %vm129_vm1, %v165_v23, %v161_v24 }
  0xb8   :  { %v734_v63 = vpop.xlane.xlu1 %216  ;;  %v736_v0 = vpop.xlane.xlu0 %213  ;;  %v201_v43 = vsel %vm200_vm5, %v166_v36, %v199_v39 }
  0xb9   :  { %v283_v60 = vrot.slane %v734_v63, %v742_v9  ;;  %v279_v61 = vrot.slane %v736_v0, %v748_v12 }
  0xbb   :  { %v284_v0 = vsel %vm129_vm1, %v283_v60, %v279_v61 }
  0xbc   :  { %v738_v2 = vpop.xlane.xlu1 %222  ;;  %v740_v3 = vpop.xlane.xlu0 %219 }
  0xbd   :  { %v292_v54 = vrot.slane %v738_v2, %v742_v9  ;;  %v288_v55 = vrot.slane %v740_v3, %v748_v12 }
  0xbf   :  { %v293_v4 = vsel %vm129_vm1, %v292_v54, %v288_v55 }
  0xc0   :  { %v89_v6 = vpop.xlane.xlu1 %88  ;;  %v86_v7 = vpop.xlane.xlu0 %85  ;;  %v348_v14 = vsel %vm194_vm2, %v293_v4, %v284_v0 }
  0xc1   :  { %v174_v27 = vrot.slane %v89_v6, %v742_v9  ;;  %v170_v28 = vrot.slane %v86_v7, %v748_v12 }
  0xc3   :  { %v175_v38 = vsel %vm129_vm1, %v174_v27, %v170_v28  ;;  %v211_v28 = vld [vmem:[#allocation3] sm:$0xff] }
  0xc4   :  { %v744_v10 = vpop.xlane.xlu1 %228  ;;  %v746_v11 = vpop.xlane.xlu0 %225  ;;  %v203_v46 = vsel %vm202_vm6, %v175_v38, %v201_v43 }
  0xc5   :  { %v301_v56 = vrot.slane %v744_v10, %v742_v9  ;;  %v297_v57 = vrot.slane %v746_v11, %v748_v12 }
  0xc7   :  { %v302_v7 = vsel %vm129_vm1, %v301_v56, %v297_v57 }
  0xc8   :  { %v95_v17 = vpop.xlane.xlu1 %94  ;;  %v92_v18 = vpop.xlane.xlu0 %91 }
  0xc9   :  { %v183_v30 = vrot.slane %v95_v17, %v742_v9  ;;  %v179_v31 = vrot.slane %v92_v18, %v748_v12  ;;  %v349_v17 = vsel %vm196_vm3, %v302_v7, %v348_v14 }
  0xcb   :  { %v184_v40 = vsel %vm129_vm1, %v183_v30, %v179_v31 }
  0xcc   :  { %v235_v32 = vpop.xlane.xlu1 %234  ;;  %v232_v33 = vpop.xlane.xlu0 %231  ;;  %v205_v48 = vsel %vm204_vm7, %v184_v40, %v203_v46 }
  0xcd   :  { %v310_v62 = vrot.slane %v235_v32, %v742_v9  ;;  %v306_v1 = vrot.slane %v232_v33, %v748_v12 }
  0xcf   :  { %v311_v10 = vsel %vm129_vm1, %v310_v62, %v306_v1 }
  0xd0   :  { %v101_v41 = vpop.xlane.xlu1 %100  ;;  %v98_v42 = vpop.xlane.xlu0 %97  ;;  %v350_v20 = vsel %vm198_vm4, %v311_v10, %v349_v17 }
  0xd1   :  { %v192_v44 = vrot.slane %v101_v41, %v742_v9  ;;  %v188_v45 = vrot.slane %v98_v42, %v748_v12 }
  0xd3   :  { %v193_v49 = vsel %vm129_vm1, %v192_v44, %v188_v45 }
  0xd4   :  { %v207_v50 = vsel %vm206_vm8, %v193_v49, %v205_v48  ;;  %v241_v51 = vpop.xlane.xlu1 %240  ;;  %v238_v52 = vpop.xlane.xlu0 %237 }
  0xd5   :  { %v209_v53 = vadd.f32 %v207_v50, %v52_v47  ;;  %v319_v2 = vrot.slane %v241_v51, %v742_v9  ;;  %v315_v3 = vrot.slane %v238_v52, %v748_v12 }
  0xd7   :  { %210 = vst.msk [vmem:[#allocation2] sm:$0xff] %vm33_vm0, %v209_v53  ;;  %v320_v15 = vsel %vm129_vm1, %v319_v2, %v315_v3 }
  0xd8   :  { %v247_v58 = vpop.xlane.xlu1 %246  ;;  %v244_v59 = vpop.xlane.xlu0 %243  ;;  %v351_v24 = vsel %vm200_vm5, %v320_v15, %v350_v20 }
  0xd9   :  { %v328_v5 = vrot.slane %v247_v58, %v742_v9  ;;  %v324_v6 = vrot.slane %v244_v59, %v748_v12 }
  0xdb   :  { %v329_v18 = vsel %vm129_vm1, %v328_v5, %v324_v6 }
  0xdc   :  { %v253_v63 = vpop.xlane.xlu1 %252  ;;  %v250_v8 = vpop.xlane.xlu0 %249  ;;  %v352_v27 = vsel %vm202_vm6, %v329_v18, %v351_v24 }
  0xdd   :  { %v337_v11 = vrot.slane %v253_v63, %v742_v9  ;;  %v333_v13 = vrot.slane %v250_v8, %v748_v12 }
  0xde   :  { %v361_v16 = vld [vmem:[#allocation2] sm:$0xff] }
  0xdf   :  { %v362_v19 = vmul.f32 0.0625, %v361_v16  ;;  %v338_v21 = vsel %vm129_vm1, %v337_v11, %v333_v13 }
  0xe0   :  { %v259_v22 = vpop.xlane.xlu1 %258  ;;  %v256_v23 = vpop.xlane.xlu0 %255  ;;  %v353_v29 = vsel %vm204_vm7, %v338_v21, %v352_v27 }
  0xe1   :  { %v346_v25 = vrot.slane %v259_v22, %v742_v9  ;;  %v342_v26 = vrot.slane %v256_v23, %v748_v12  ;;  %582 = vmatprep.mubr.msk.f32.mxu0 %vm33_vm0, %v362_v19  ;;  %v366_v9 = vld [vmem:[%s842_s2] sm:$0xf] }
  0xe2   :  { %585 = vmatprep.subr.msk.mxu1 %vm457_vm9, %v366_v9 }
  0xe3   :  { %v347_v30 = vsel %vm129_vm1, %v346_v25, %v342_v26  ;;  %586 = vmatpush3.msk.msra.mxu1 %vm457_vm9, %v366_v9 }
  0xe4   :  { %v354_v31 = vsel %vm206_vm8, %v347_v30, %v353_v29 }
  0xe5   :  { %v356_v32 = vmax.f32 %v211_v28, %v354_v31 }
  0xe7   :  { %357 = vst.msk [vmem:[#allocation3] sm:$0xff] %vm33_vm0, %v356_v32 }
  0xee   :  { %v363_v33 = vld [vmem:[#allocation3] sm:$0xff] }
  0xef   :  { %583 = vmatmul.mubr.msk.f32.vlgmr.msra.gmra.mrb[0].mxu0 %vm33_vm0, %v363_v33 }
 0x1c2   :  { %v584_v12 = vpop.f32.mrb[0].mxu0 }
 0x1c3   :  { %v439_v34 = vpop.f32.mrb[1].mxu0  ;;  %v449_v36 = vmax.f32 %v584_v12, 0.0 }
 0x1c4   :  { %v448_v35 = vmax.f32 %v439_v34, 0.0 }
 0x1c6   :  { %587 = vmatprep.mubr.msk.f32.mxu1 %vm450_vm10, %v448_v35 }
 0x1c7   :  { %588 = vmatmul.mubr.msk.f32.vlgmr.msra.gmra.mrb[0].mxu1 %vm450_vm10, %v449_v36 }
 0x29a   :  { %v589_v37 = vpop.f32.mrb[0].mxu1 }
 0x29b   :  { %v527_v38 = vpop.f32.mrb[1].mxu1 }
 0x29c   :  { %v536_v39 = vadd.f32 %v589_v37, %v527_v38 }
 0x29e   :  { %v537_v40 = vsel %vm33_vm0, %v536_v39, -inf }
 0x29f   :  { %538 = vmax.xlane.f32.xlu0 %v537_v40 }
 0x32c   :  { %v539_v41 = vpop.xlane.xlu0 %538 }
 0x32d   :  { %v540_v42 = vsub.f32 %v536_v39, %v539_v41 }
 0x32f   :  { %v541_v43 = vmul.f32 1.442695, %v540_v42 }
 0x331   :  { %602 = vpow2.f32 %v541_v43 }
 0x33b   :  { %v603_v44 = vpop.eup %602 }
 0x33c   :  { %v543_v45 = vsel %vm33_vm0, %v603_v44, 0.0 }
 0x33d   :  { %544 = vadd.xlane.f32.xlu1 %v543_v45 }
 0x3ca   :  { %v545_v46 = vpop.xlane.xlu1 %544 }
 0x3cb   :  { %604 = vrcp.f32 %v545_v46 }
 0x3d5   :  { %v605_v47 = vpop.eup %604 }
 0x3d6   :  { %v547_v48 = vmul.f32 %v605_v47, %v603_v44 }
 0x3d8   :  { %548 = vst.msk [vmem:[#allocation7] sm:$0xff] %vm33_vm0, %v547_v48 }
 0x3d9   :  { %553 = vsyncadd [#allocation6], 96  ;;  %s659_s2 = smov [#allocation7]  }
 0x3da   :  { %s554_s4 = sshll.u32 %s659_s2, 4  ;;  %s555_s4 = int_to_ptr.vmem [resolvable:$true] %s554_s4 }
 0x3db   :  { %s628_s5 = scalar_lea.vmem %s555_s4, 32  ;;  %s632_s6 = scalar_lea.vmem %s555_s4, 128 }
 0x3dc   :  { %p629_p8 = scmp.ne.s32.totalorder %s555_s4, %s628_s5  ;;  %p633_p9 = scmp.lt.s32.totalorder %s555_s4, %s555_s4 }
 0x3dd   :  { %p634_p10 = scmp.lt.s32.totalorder %s632_s6, %s628_s5 }
 0x3df   :  { %p635_p11 = por %p634_p10, %p633_p9 }
 0x3e1   :  { %p636_p12 = pnand %p635_p11, %p629_p8 }
 0x3e3   :  { %639 = shalt.err (!%p636_p12)
}
 0x3e4   :  { %s640_s9 = scalar_lea.hbm %s843_s3, 32 }
 0x3e5   :  { %p641_p13 = scmp.ne.s32.totalorder %s843_s3, %s640_s9  ;;  %p644_p0 = scmp.lt.u32.totalorder %s640_s9, %s843_s3 }
 0x3e7   :  { %p646_p1 = pnand %p644_p0, %p641_p13 }
 0x3e9   :  { %649 = shalt.err (!%p646_p1)
}
 0x3ea   :  { %s660_s14 = smov 32   ;;  %s661_s15 = smov 2  }
 0x3eb   :  { %560 = dma.vmem_to_hbm [thread:$0]  %s555_s4, 32, %s843_s3, [#allocation6], %s660_s14, %s660_s14, %s661_s15  }
 0x3ec   :  { %652 = dma.done.wait [#allocation6], 128  }
 0x3ed   :  { %653 = vsyncadd [#allocation6], 4294967168 }
 0x3ee   :  { %564 = vsyncpa [#allocation5], 1 }
 0x3ef   :  { %565 = vsyncpa [#allocation6], 1 }

</bundles_post_ra>
